<compile_context>
chip_gen: v6e
topology: v6e:2x2x1
jax: 0.10.0
libtpu: 0.0.40
codegen_flags: <defaults>
</compile_context>

<pallas_src>
import functools

import jax
import jax.numpy as jnp
from jax import lax
from jax.experimental import pallas as pl
from jax.experimental.pallas import tpu as pltpu


def _round_up(x, m):
    return ((x + m - 1) // m) * m


def _pad_dim_and_tile(dim, tile, base):
    """Pad `dim` up to hardware alignment `base`; return (padded_dim, effective_tile).

    If the padded dim fits inside one tile, use a single full-extent block;
    otherwise pad further so the tile divides the padded dim exactly.
    """
    padded = _round_up(dim, base)
    if padded <= tile:
        return padded, padded
    return _round_up(padded, tile), tile


def rotation_kernel(x_ref, w_ref, b_ref, o_ref, acc_ref):
    """Compute one (tm, tn) output tile, accumulating over the K grid axis.

    x_ref  : (tm, tk)  activation tile
    w_ref  : (tn, tk)  weight tile in torch layout (out_features, in_features)
    b_ref  : (1,  tn)  bias slice for this output-column tile
    o_ref  : (tm, tn)  output tile
    acc_ref: (tm, tn)  f32 accumulator scratch (resident across the K axis)
    """
    k = pl.program_id(2)

    @pl.when(k == 0)
    def _init():
        # Fold the bias into the accumulator init: added exactly once per tile.
        acc_ref[...] = jnp.broadcast_to(
            b_ref[...].astype(jnp.float32), acc_ref.shape
        )

    # y = x @ W.T  ==  contract dim 1 of x with dim 1 of W (torch layout).
    acc_ref[...] += lax.dot_general(
        x_ref[...],
        w_ref[...],
        dimension_numbers=(((1,), (1,)), ((), ())),
        preferred_element_type=jnp.float32,
    )

    @pl.when(k == pl.num_programs(2) - 1)
    def _finalize():
        o_ref[...] = acc_ref[...].astype(o_ref.dtype)


@functools.partial(jax.jit, static_argnames=("tm", "tn", "tk"))
def _rotation_forward_2d(x, weight, bias, *, tm=256, tn=512, tk=512):
    B, F = x.shape

    # Pad to lane/sublane-aligned, tile-divisible sizes (no-op when already aligned).
    Mp, tm = _pad_dim_and_tile(B, tm, 8)
    Np, tn = _pad_dim_and_tile(F, tn, 128)
    Kp, tk = _pad_dim_and_tile(F, tk, 128)

    xp = x if (Mp == B and Kp == F) else jnp.pad(x, ((0, Mp - B), (0, Kp - F)))
    wp = weight if (Np == F and Kp == F) else jnp.pad(
        weight, ((0, Np - F), (0, Kp - F)))
    bp = bias.reshape(1, F)
    if Np != F:
        bp = jnp.pad(bp, ((0, 0), (0, Np - F)))

    grid = (Mp // tm, Np // tn, Kp // tk)

    # Scoped-VMEM budget: double-buffered x/W/bias/out blocks + acc scratch, with headroom.
    block_bytes = 4 * (2 * tm * tk + 2 * tn * tk + 2 * tn + 2 * tm * tn + tm * tn)
    vmem_limit = min(max(block_bytes + (8 << 20), 16 << 20), 96 << 20)

    out_padded = pl.pallas_call(
        rotation_kernel,
        out_shape=jax.ShapeDtypeStruct((Mp, Np), x.dtype),
        grid_spec=pltpu.PrefetchScalarGridSpec(
            num_scalar_prefetch=0,
            grid=grid,
            in_specs=[
                pl.BlockSpec((tm, tk), lambda i, j, k: (i, k)),  # x
                pl.BlockSpec((tn, tk), lambda i, j, k: (j, k)),  # W (torch layout)
                pl.BlockSpec((1, tn), lambda i, j, k: (0, j)),   # bias (by out-col only)
            ],
            out_specs=pl.BlockSpec((tm, tn), lambda i, j, k: (i, j)),
            scratch_shapes=[pltpu.VMEM((tm, tn), jnp.float32)],
        ),
        compiler_params=pltpu.CompilerParams(
            dimension_semantics=("parallel", "parallel", "arbitrary"),
            vmem_limit_bytes=vmem_limit,
        ),
        cost_estimate=pl.CostEstimate(
            flops=2 * B * F * F,
            transcendentals=0,
            bytes_accessed=4 * (B * F + F * F + F + B * F),
        ),
    )(xp, wp, bp)

    if Mp == B and Np == F:
        return out_padded
    return out_padded[:B, :F]


def rotation_forward(x, weight, bias, *, tm=256, tn=512, tk=512):
    """Rotation forward pass: y = x @ weight.T + bias (PyTorch nn.Linear convention).

    Args:
      x:      (..., F) float32 (arbitrary leading dims, like nn.Linear)
      weight: (F, F)   float32, torch layout (out_features, in_features) -- NOT transposed
      bias:   (F,)     float32
      tm/tn/tk: M/N/K tile sizes (auto-clamped to the padded problem size).
    Returns:
      (..., F) float32
    """
    F = x.shape[-1]
    assert weight.shape == (F, F), weight.shape
    assert bias.shape == (F,), bias.shape
    lead = x.shape[:-1]
    x2 = x.reshape(-1, F)
    y2 = _rotation_forward_2d(x2, weight, bias, tm=tm, tn=tn, tk=tk)
    return y2.reshape(*lead, F)


def make_rotation_params(key, n_features, init_identity=True, add_one=False):
    """Deterministic synthetic parameter init mirroring Rotation.__init__."""
    if add_one:
        n_features += 1
    k_w, k_b = jax.random.split(key)
    bound = 1.0 / jnp.sqrt(jnp.float32(n_features))
    weight = jax.random.uniform(
        k_w, (n_features, n_features), minval=-bound, maxval=bound, dtype=jnp.float32
    )
    bias = jax.random.uniform(
        k_b, (n_features,), minval=-bound, maxval=bound, dtype=jnp.float32
    )
    if init_identity:
        weight = weight + jnp.eye(n_features, dtype=jnp.float32)
        bias = jnp.zeros((n_features,), dtype=jnp.float32)
    return weight, bias


def _reference(x, weight, bias):
    return jnp.dot(x, weight.T, precision=lax.Precision.HIGHEST) + bias


if __name__ == "__main__":
    key = jax.random.PRNGKey(0)
    k_x, k_p, k2_x, k2_p = jax.random.split(key, 4)

    # Case 1: the module's nominal small shape (feature_shape=(32,), add_one=False).
    batch, n_features = 8, 32
    weight, bias = make_rotation_params(k_p, n_features, init_identity=True)
    x = jax.random.normal(k_x, (batch, n_features), dtype=jnp.float32)

    y = jax.block_until_ready(rotation_forward(x, weight, bias))
    y_ref = _reference(x, weight, bias)
    assert y.shape == (batch, n_features)
    assert jnp.allclose(y, y_ref, atol=1e-4, rtol=1e-4), "mismatch vs reference (32)"

    # Case 2: a slightly larger shape with small explicit tiles so the
    # multi-step K accumulation / pl.when init+finalize path is exercised.
    batch2, n_features2 = 16, 256
    weight2, bias2 = make_rotation_params(k2_p, n_features2, init_identity=False)
    x2 = jax.random.normal(k2_x, (batch2, n_features2), dtype=jnp.float32)

    y2 = jax.block_until_ready(
        rotation_forward(x2, weight2, bias2, tm=8, tn=128, tk=128)
    )
    y2_ref = _reference(x2, weight2, bias2)
    assert y2.shape == (batch2, n_features2)
    assert jnp.allclose(y2, y2_ref, atol=1e-4, rtol=1e-4), "mismatch vs reference (256)"

    print("KERNEL_OK")
</pallas_src>

<mosaic_0001>
module attributes {stable_mosaic.version = 11 : i64} {
  func.func @rotation_kernel(%arg0: i32, %arg1: i32, %arg2: i32, %arg3: memref<8x128xf32, #tpu.memory_space<vmem>>, %arg4: memref<128x128xf32, #tpu.memory_space<vmem>>, %arg5: memref<1x128xf32, #tpu.memory_space<vmem>>, %arg6: memref<8x128xf32, #tpu.memory_space<vmem>>, %arg7: memref<8x128xf32, #tpu.memory_space<vmem>>) attributes {dimension_semantics = [#tpu.dimension_semantics<parallel>, #tpu.dimension_semantics<parallel>, #tpu.dimension_semantics<arbitrary>], iteration_bounds = array<i64: 1, 1, 1>, scalar_prefetch = 0 : i64, scratch_operands = 1 : i64, tpu.core_type = #tpu.core_type<tc>, window_params = [{transform_indices = @transform_0, window_bounds = array<i64: 8, 128>}, {transform_indices = @transform_1, window_bounds = array<i64: 128, 128>}, {transform_indices = @transform_2, window_bounds = array<i64: 1, 128>}, {transform_indices = @transform_3, window_bounds = array<i64: 8, 128>}]} {
    %c0_i32 = arith.constant 0 : i32
    %0 = arith.cmpi eq, %arg2, %c0_i32 : i32
    %1 = arith.extui %0 : i1 to i32
    %c0_i32_0 = arith.constant 0 : i32
    %2 = arith.cmpi ne, %1, %c0_i32_0 : i32
    scf.if %2 {
      %c0_10 = arith.constant 0 : index
      %c0_11 = arith.constant 0 : index
      %12 = vector.load %arg5[%c0_10, %c0_11] : memref<1x128xf32, #tpu.memory_space<vmem>>, vector<1x128xf32>
      %13 = vector.shape_cast %12 : vector<1x128xf32> to vector<1x128xf32>
      %14 = vector.broadcast %13 : vector<1x128xf32> to vector<8x128xf32>
      %c0_12 = arith.constant 0 : index
      %c0_13 = arith.constant 0 : index
      %15 = vector.load %arg7[%c0_12, %c0_13] : memref<8x128xf32, #tpu.memory_space<vmem>>, vector<8x128xf32>
      tpu.vector_store %arg7[%c0_12, %c0_13], %14 {strides = array<i32>} : memref<8x128xf32, #tpu.memory_space<vmem>>, vector<8x128xf32>,
    } else {
    }
    %c0 = arith.constant 0 : index
    %c0_1 = arith.constant 0 : index
    %3 = vector.load %arg7[%c0, %c0_1] : memref<8x128xf32, #tpu.memory_space<vmem>>, vector<8x128xf32>
    %c0_2 = arith.constant 0 : index
    %c0_3 = arith.constant 0 : index
    %4 = vector.load %arg3[%c0_2, %c0_3] : memref<8x128xf32, #tpu.memory_space<vmem>>, vector<8x128xf32>
    %c0_4 = arith.constant 0 : index
    %c0_5 = arith.constant 0 : index
    %5 = vector.load %arg4[%c0_4, %c0_5] : memref<128x128xf32, #tpu.memory_space<vmem>>, vector<128x128xf32>
    %cst = arith.constant dense<0.000000e+00> : vector<8x128xf32>
    %6 = tpu.matmul %4, %5, %cst {dimension_numbers = #tpu.dot_dimension_numbers<[1], [1], [0], [0], [0, 0, 1, 0], [], []>} : vector<8x128xf32>, vector<128x128xf32>, vector<8x128xf32> -> vector<8x128xf32>
    %7 = arith.addf %3, %6 : vector<8x128xf32>
    %c0_6 = arith.constant 0 : index
    %c0_7 = arith.constant 0 : index
    %8 = vector.load %arg7[%c0_6, %c0_7] : memref<8x128xf32, #tpu.memory_space<vmem>>, vector<8x128xf32>
    tpu.vector_store %arg7[%c0_6, %c0_7], %7 {strides = array<i32>} : memref<8x128xf32, #tpu.memory_space<vmem>>, vector<8x128xf32>,
    %c0_i32_8 = arith.constant 0 : i32
    %9 = arith.cmpi eq, %arg2, %c0_i32_8 : i32
    %10 = arith.extui %9 : i1 to i32
    %c0_i32_9 = arith.constant 0 : i32
    %11 = arith.cmpi ne, %10, %c0_i32_9 : i32
    scf.if %11 {
      %c0_10 = arith.constant 0 : index
      %c0_11 = arith.constant 0 : index
      %12 = vector.load %arg7[%c0_10, %c0_11] : memref<8x128xf32, #tpu.memory_space<vmem>>, vector<8x128xf32>
      %c0_12 = arith.constant 0 : index
      %c0_13 = arith.constant 0 : index
      %13 = vector.load %arg6[%c0_12, %c0_13] : memref<8x128xf32, #tpu.memory_space<vmem>>, vector<8x128xf32>
      tpu.vector_store %arg6[%c0_12, %c0_13], %12 {strides = array<i32>} : memref<8x128xf32, #tpu.memory_space<vmem>>, vector<8x128xf32>,
    } else {
    }
    return
  }
  func.func @transform_0(%arg0: i32, %arg1: i32, %arg2: i32) -> (i32, i32) {
    %c0_i32 = arith.constant 0 : i32
    return %arg0, %arg2 : i32, i32
  }
  func.func @transform_1(%arg0: i32, %arg1: i32, %arg2: i32) -> (i32, i32) {
    %c0_i32 = arith.constant 0 : i32
    return %arg1, %arg2 : i32, i32
  }
  func.func @transform_2(%arg0: i32, %arg1: i32, %arg2: i32) -> (i32, i32) {
    %c0_i32 = arith.constant 0 : i32
    %c0_i32_0 = arith.constant 0 : i32
    return %c0_i32, %arg1 : i32, i32
  }
  func.func @transform_3(%arg0: i32, %arg1: i32, %arg2: i32) -> (i32, i32) {
    %c0_i32 = arith.constant 0 : i32
    return %arg0, %arg1 : i32, i32
  }
}

</mosaic_0001>

<bundles_post_ra>
// kernel: _rotation_forward_2d.1
= control target key start
LH: loop header
LB: loop body
LE: loop exit
PB: predicated region body
PF: predicated region fallthrough
CT: control target
= control target key end

     0   :  { %v214_v1 = vmov 0.0   ;;  %vm215_vm0 = vmmov 0   ;;  %s294_s0 = inlined_call_operand.vmem [shape: f32[8,128], index: 0, kind: input, shape index: {}]   ;;  %s295_s1 = inlined_call_operand.vmem [shape: f32[128,128], index: 1, kind: input, shape index: {}]   ;;  %s296_s2 = inlined_call_operand.vmem [shape: f32[1,128], index: 2, kind: input, shape index: {}]   ;;  %s297_s3 = inlined_call_operand.hbm [shape: f32[8,128], index: 3, kind: output, shape index: {}]  }
   0x1   :  { %v44_v0 = vld [vmem:[%s295_s1 + $0x78] sm:$0xff]  ;;  %154 = vmatprep.subr.mxu0 %v214_v1  ;;  %186 = vmatprep.mubr.msk.f32.mxu0 %vm215_vm0, %v214_v1  ;;  %v43_v2 = vld [vmem:[%s295_s1 + $0x70] sm:$0xff] }
   0x2   :  { %155 = vmatpush3.xpose.msra.mxu0 %v44_v0 }
   0x3   :  { %156 = vmatprep.subr.mxu0 %v214_v1 }
   0x6   :  { %157 = vmatpush3.xpose.msra.mxu0 %v43_v2 }
   0x7   :  { %8 = vsyncpa [#allocation4], 0  ;;  %158 = vmatprep.subr.mxu0 %v214_v1  ;;  %v42_v3 = vld [vmem:[%s295_s1 + $0x68] sm:$0xff]  ;;  %v41_v4 = vld [vmem:[%s295_s1 + $0x60] sm:$0xff]  ;;  %s216_s21 = smov [#allocation3]  }
   0x8   :  { %v40_v5 = vld [vmem:[%s295_s1 + $0x58] sm:$0xff]  ;;  %v39_v6 = vld [vmem:[%s295_s1 + $0x50] sm:$0xff]  ;;  %v38_v7 = vld [vmem:[%s295_s1 + $0x48] sm:$0xff]  ;;  %s128_s22 = sshll.u32 %s216_s21, 4  ;;  %s129_s22 = int_to_ptr.vmem [resolvable:$true] %s128_s22 }
   0x9   :  { %v37_v8 = vld [vmem:[%s295_s1 + $0x40] sm:$0xff]  ;;  %v36_v9 = vld [vmem:[%s295_s1 + $0x38] sm:$0xff]  ;;  %v35_v10 = vld [vmem:[%s295_s1 + $0x30] sm:$0xff]  ;;  %s192_s23 = scalar_lea.vmem %s129_s22, 128  ;;  %p197_p1 = scmp.lt.s32.totalorder %s129_s22, %s129_s22 }
   0xa   :  { %159 = vmatpush3.xpose.msra.mxu0 %v42_v3  ;;  %v34_v11 = vld [vmem:[%s295_s1 + $0x28] sm:$0xff]  ;;  %v33_v12 = vld [vmem:[%s295_s1 + $0x20] sm:$0xff]  ;;  %v32_v13 = vld [vmem:[%s295_s1 + $0x18] sm:$0xff]  ;;  %p193_p0 = scmp.ne.s32.totalorder %s129_s22, %s192_s23  ;;  %p198_p2 = scmp.lt.s32.totalorder %s192_s23, %s192_s23 }
   0xb   :  { %160 = vmatprep.subr.mxu0 %v214_v1  ;;  %v31_v14 = vld [vmem:[%s295_s1 + $0x10] sm:$0xff]  ;;  %v30_v15 = vld [vmem:[%s295_s1 + $0x8] sm:$0xff]  ;;  %v29_v16 = vld [vmem:[%s295_s1] sm:$0xff] }
   0xc   :  { %v28_v17 = vld [vmem:[%s294_s0] sm:$0xff]  ;;  %p199_p3 = por %p198_p2, %p197_p1 }
   0xd   :  { %v136_v18 = vld [vmem:[%s296_s2] ss:$0 sm:$0xff] }
   0xe   :  { %161 = vmatpush3.xpose.msra.mxu0 %v41_v4  ;;  %p200_p4 = pnand %p199_p3, %p193_p0 }
   0xf   :  { %162 = vmatprep.subr.mxu0 %v214_v1 }
  0x12   :  { %163 = vmatpush3.xpose.msra.mxu0 %v40_v5 }
  0x13   :  { %164 = vmatprep.subr.mxu0 %v214_v1 }
  0x16   :  { %165 = vmatpush3.xpose.msra.mxu0 %v39_v6 }
  0x17   :  { %166 = vmatprep.subr.mxu0 %v214_v1 }
  0x1a   :  { %167 = vmatpush3.xpose.msra.mxu0 %v38_v7 }
  0x1b   :  { %168 = vmatprep.subr.mxu0 %v214_v1 }
  0x1e   :  { %169 = vmatpush3.xpose.msra.mxu0 %v37_v8 }
  0x1f   :  { %170 = vmatprep.subr.mxu0 %v214_v1 }
  0x22   :  { %171 = vmatpush3.xpose.msra.mxu0 %v36_v9 }
  0x23   :  { %172 = vmatprep.subr.mxu0 %v214_v1 }
  0x26   :  { %173 = vmatpush3.xpose.msra.mxu0 %v35_v10 }
  0x27   :  { %174 = vmatprep.subr.mxu0 %v214_v1 }
  0x2a   :  { %175 = vmatpush3.xpose.msra.mxu0 %v34_v11 }
  0x2b   :  { %176 = vmatprep.subr.mxu0 %v214_v1 }
  0x2e   :  { %177 = vmatpush3.xpose.msra.mxu0 %v33_v12 }
  0x2f   :  { %178 = vmatprep.subr.mxu0 %v214_v1 }
  0x32   :  { %179 = vmatpush3.xpose.msra.mxu0 %v32_v13 }
  0x33   :  { %180 = vmatprep.subr.mxu0 %v214_v1 }
  0x36   :  { %181 = vmatpush3.xpose.msra.mxu0 %v31_v14 }
  0x37   :  { %182 = vmatprep.subr.mxu0 %v214_v1 }
  0x3a   :  { %183 = vmatpush3.xpose.msra.mxu0 %v30_v15 }
  0x3b   :  { %184 = vmatprep.subr.mxu0 %v214_v1 }
  0x3e   :  { %185 = vmatpush3.xpose.msra.mxu0 %v29_v16 }
  0x41   :  { %187 = vmatmul.mubr.f32.vlgmr.msra.gmra.mxu0 %v28_v17 }
 0x101   :  { %v111_v19 = vpop.f32.mrf.mxu0 }
 0x102   :  { %v115_v20 = vadd.f32 %v136_v18, %v111_v19 }
 0x103   :  { %v188_v21 = vpop.f32.mrf.mxu0 }
 0x104   :  { %121 = vst [vmem:[#allocation3] sm:$0xff] %v115_v20 }
 0x105   :  { %203 = shalt.err (!%p200_p4)
}
 0x106   :  { %131 = dma.vmem_to_hbm [thread:$0]  %s129_s22, 128, %s297_s3, [#allocation4]  }
 0x107   :  { %212 = dma.done.wait [#allocation4], 128  }
 0x108   :  { %213 = vsyncadd [#allocation4], 4294967168 }
 0x109   :  { %135 = vsyncpa [#allocation4], 1 }

</bundles_post_ra>
